<compile_context>
chip_gen: v7x
topology: tpu7x:2x2x1
jax: 0.10.0
libtpu: 0.0.40
codegen_flags: <defaults>
</compile_context>

<pallas_src>
import numpy as np
import jax
import jax.numpy as jnp
from jax.experimental import pallas as pl
from jax.experimental.pallas import tpu as pltpu

_H, _W, _K = 6, 7, 4                   # conv a1 input spatial dims / kernel
_HO, _WO = _H - _K + 1, _W - _K + 1    # 3, 4
_NPOS = _HO * _WO                      # 12 spatial positions after conv a1
_NX = 3 * _H * _W                      # 126 input elements


# ----------------------------- Pallas kernel --------------------------------
def net_kernel(x_ref, slab_ref, scal_ref, out_ref):
    # x_ref    (VMEM, f32[1,128])  : x flattened into lanes 0..125, 126/127 = 0
    # scal_ref (SMEM, f32[16])     : [b1_0,b1_1,b1_2, w2_00,w2_01,w2_02,
    #                                 w2_10,w2_11,w2_12, b2_0,b2_1,
    #                                 w3_0,w3_1, b3_0, 0,0]
    # slab_ref (VMEM, f32[144,128]):
    #   rows 0..127  : W1_eff (im2col folded into the conv weights);
    #                  output lanes c*12+p = conv channel c, position p
    #   rows 128..139: wfc^T (12,7) in lanes 0..6, zeros elsewhere
    #   row  140     : lanes 0..6 = bfc, lanes 7..127 = -1e30 (softmax mask)
    #   rows 141..143: zeros (absorb garbage h3 lanes 13..15)

    # conv a1 (+ folded im2col): one MXU matmul over the 128-lane x row.
    mm = jnp.dot(x_ref[...], slab_ref[0:128, :],
                 preferred_element_type=jnp.float32)               # (1, 128)

    # Realign the three output channels onto lanes 0..11 (XLU lane rotations),
    # then drop to width 16 so the VPU chain works on a single masked vreg.
    r1 = pltpu.roll(mm, 128 - _NPOS, 1)        # lane j <- mm[j + 12]
    r2 = pltpu.roll(mm, 128 - 2 * _NPOS, 1)    # lane j <- mm[j + 24]
    c0 = mm[:, 0:16]                           # ch0 in lanes 0..11
    c1 = r1[:, 0:16]                           # ch1 in lanes 0..11
    c2 = r2[:, 0:16]                           # ch2 in lanes 0..11

    h1_0 = jnp.maximum(c0 + scal_ref[0], 0.0)
    h1_1 = jnp.maximum(c1 + scal_ref[1], 0.0)
    h1_2 = jnp.maximum(c2 + scal_ref[2], 0.0)

    # 1x1 convs a2/a3 as VPU scalar-broadcast FMAs (kept off the MXU).
    h2_0 = jnp.maximum(scal_ref[3] * h1_0 + scal_ref[4] * h1_1
                       + scal_ref[5] * h1_2 + scal_ref[9], 0.0)
    h2_1 = jnp.maximum(scal_ref[6] * h1_0 + scal_ref[7] * h1_1
                       + scal_ref[8] * h1_2 + scal_ref[10], 0.0)
    h3 = jnp.maximum(scal_ref[11] * h2_0 + scal_ref[12] * h2_1
                     + scal_ref[13], 0.0)                          # (1, 16)

    # Homogeneous lane: force lane 12 to 1.0 so the fc matmul also adds bfc and
    # the -1e30 softmax mask for lanes 7..127 (baked into slab row 140).
    # Garbage lanes 13..15 hit zero slab rows 141..143 -> contribute exactly 0.
    lane = jax.lax.broadcasted_iota(jnp.int32, (1, 16), 1)
    h3_aug = jnp.where(lane == _NPOS, 1.0, h3)                     # (1, 16)

    logits = jnp.dot(h3_aug, slab_ref[128:144, :],
                     preferred_element_type=jnp.float32)           # (1, 128)
    m = jnp.max(logits, axis=-1, keepdims=True)
    e = jnp.exp(logits - m)                    # masked lanes underflow to 0
    inv = pl.reciprocal(jnp.sum(e, axis=-1, keepdims=True), approx=False)
    out_ref[...] = e * inv                                         # lane-dense store


# --------------------------- one-time param packing --------------------------
def prepare_params(params):
    w1, b1, w2, b2, w3, b3, wfc, bfc = params
    w1n = np.asarray(w1, np.float32)                               # (3,3,4,4)

    # Fold im2col into the conv weights: W1_eff[j, c*12+p] multiplies x_flat[j].
    w1eff = np.zeros((128, 128), np.float32)
    for co in range(3):
        for ho in range(_HO):
            for wo in range(_WO):
                p = ho * _WO + wo
                for cin in range(3):
                    for kh in range(_K):
                        for kw in range(_K):
                            j = cin * _H * _W + (ho + kh) * _W + (wo + kw)
                            w1eff[j, co * _NPOS + p] = w1n[co, cin, kh, kw]

    slab = np.zeros((144, 128), np.float32)
    slab[0:128, :] = w1eff
    slab[128:128 + _NPOS, 0:7] = np.asarray(wfc, np.float32).T     # (12,7)
    slab[128 + _NPOS, 0:7] = np.asarray(bfc, np.float32)           # bias row
    slab[128 + _NPOS, 7:128] = -1e30                               # softmax mask

    scal = np.zeros((16,), np.float32)
    scal[0:3] = np.asarray(b1, np.float32).reshape(3)
    scal[3:9] = np.asarray(w2, np.float32).reshape(6)
    scal[9:11] = np.asarray(b2, np.float32).reshape(2)
    scal[11:13] = np.asarray(w3, np.float32).reshape(2)
    scal[13] = np.asarray(b3, np.float32).reshape(1)[0]
    return jnp.asarray(slab), jnp.asarray(scal)


# ------------------------------ JAX wrapper ----------------------------------
@jax.jit
def net_forward(x, slab, scal):
    # torch's x.view(-1,3,6,7) + full flatten() + fc(12,.) forces a single sample.
    assert x.size == _NX, "Net.forward implies a single (3,6,7) sample"
    x_flat = x.reshape(-1).astype(jnp.float32)
    x_row = jnp.pad(x_flat, (0, 128 - _NX)).reshape(1, 128)        # 512 B operand
    out = pl.pallas_call(
        net_kernel,
        out_shape=jax.ShapeDtypeStruct((1, 128), jnp.float32),
        in_specs=[
            pl.BlockSpec(memory_space=pltpu.MemorySpace.VMEM),     # x row
            pl.BlockSpec(memory_space=pltpu.MemorySpace.VMEM),     # weight slab
            pl.BlockSpec(memory_space=pltpu.MemorySpace.SMEM),     # scalars
        ],
        out_specs=pl.BlockSpec(memory_space=pltpu.MemorySpace.VMEM),
    )(x_row, slab, scal)
    return out[0, :7]


# ---------------------------- pure-JAX reference -----------------------------
def ref_forward(x, params):
    """Reference. conv a1 uses lax.conv; the 1x1 convs are expanded as exact
    per-channel linear mixes (mathematically identical to k=1 convs)."""
    w1, b1, w2, b2, w3, b3, wfc, bfc = params
    xv = x.reshape(-1, 3, _H, _W).astype(jnp.float32)
    dn = ("NCHW", "OIHW", "NCHW")
    y1 = jax.lax.conv_general_dilated(xv, w1, (1, 1), "VALID",
                                      dimension_numbers=dn)
    y1 = jax.nn.relu(y1 + b1.reshape(1, 3, 1, 1))                  # (1,3,3,4)
    w2m = w2.reshape(2, 3)
    w3m = w3.reshape(1, 2)
    c0, c1, c2 = y1[:, 0], y1[:, 1], y1[:, 2]                      # (1,3,4) each
    y2_0 = jax.nn.relu(w2m[0, 0] * c0 + w2m[0, 1] * c1 + w2m[0, 2] * c2 + b2[0])
    y2_1 = jax.nn.relu(w2m[1, 0] * c0 + w2m[1, 1] * c1 + w2m[1, 2] * c2 + b2[1])
    y3 = jax.nn.relu(w3m[0, 0] * y2_0 + w3m[0, 1] * y2_1 + b3[0])  # (1,3,4)
    flat = y3.reshape(-1)                                          # (12,)
    logits = flat @ wfc.T + bfc                                    # (7,)
    return jax.nn.softmax(logits, axis=0)


def init_params(key):
    ks = jax.random.split(key, 8)

    def u(k, shape, fan_in):
        bound = 1.0 / jnp.sqrt(fan_in)
        return jax.random.uniform(k, shape, jnp.float32, -bound, bound)

    w1 = u(ks[0], (3, 3, 4, 4), 3 * 4 * 4)
    b1 = u(ks[1], (3,),         3 * 4 * 4)
    w2 = u(ks[2], (2, 3, 1, 1), 3)
    b2 = u(ks[3], (2,),         3)
    w3 = u(ks[4], (1, 2, 1, 1), 2)
    b3 = u(ks[5], (1,),         2)
    wfc = u(ks[6], (7, 12),     12)
    bfc = u(ks[7], (7,),        12)
    return (w1, b1, w2, b2, w3, b3, wfc, bfc)


if __name__ == "__main__":
    key = jax.random.PRNGKey(0)
    k_x, k_p = jax.random.split(key)
    x = jax.random.normal(k_x, (1, 3, 6, 7), jnp.float32)   # 126 elems, NCHW
    params = init_params(k_p)
    slab, scal = prepare_params(params)                     # packed once

    out = jax.block_until_ready(net_forward(x, slab, scal))
    ref = jax.block_until_ready(ref_forward(x, params))

    assert out.shape == (7,)
    # Exact reciprocal now -> probabilities sum to 1 to f32 precision.
    assert float(jnp.abs(jnp.sum(out) - 1.0)) < 1e-3
    assert jnp.allclose(out, ref, atol=1e-3, rtol=1e-3), (out, ref)
    print("KERNEL_OK")
</pallas_src>

<mosaic_0001>
module attributes {stable_mosaic.version = 11 : i64} {
  func.func @net_kernel(%arg0: memref<1x128xf32, #tpu.memory_space<vmem>>, %arg1: memref<144x128xf32, #tpu.memory_space<vmem>>, %arg2: memref<16xf32, #tpu.memory_space<smem>>, %arg3: memref<1x128xf32, #tpu.memory_space<vmem>>) attributes {dimension_semantics = [], scalar_prefetch = 0 : i64, scratch_operands = 0 : i64, tpu.core_type = #tpu.core_type<tc>} {
    %c0 = arith.constant 0 : index
    %c0_0 = arith.constant 0 : index
    %0 = vector.load %arg0[%c0, %c0_0] : memref<1x128xf32, #tpu.memory_space<vmem>>, vector<1x128xf32>
    %c0_1 = arith.constant 0 : index
    %c0_2 = arith.constant 0 : index
    %1 = vector.load %arg1[%c0_1, %c0_2] : memref<144x128xf32, #tpu.memory_space<vmem>>, vector<128x128xf32>
    %cst = arith.constant dense<0.000000e+00> : vector<1x128xf32>
    %2 = tpu.matmul %0, %1, %cst {dimension_numbers = #tpu.dot_dimension_numbers<[1], [0], [0], [1], [0, 0, 1, 1], [], []>} : vector<1x128xf32>, vector<128x128xf32>, vector<1x128xf32> -> vector<1x128xf32>
    %c116_i32 = arith.constant 116 : i32
    %3 = tpu.dynamic_rotate %2 by %c116_i32 dim 1 : vector<1x128xf32>, i32 -> vector<1x128xf32>
    %c104_i32 = arith.constant 104 : i32
    %4 = tpu.dynamic_rotate %2 by %c104_i32 dim 1 : vector<1x128xf32>, i32 -> vector<1x128xf32>
    %5 = vector.extract_strided_slice %2 {offsets = [0, 0], sizes = [1, 16], strides = [1, 1]} : vector<1x128xf32> to vector<1x16xf32>
    %6 = vector.extract_strided_slice %3 {offsets = [0, 0], sizes = [1, 16], strides = [1, 1]} : vector<1x128xf32> to vector<1x16xf32>
    %7 = vector.extract_strided_slice %4 {offsets = [0, 0], sizes = [1, 16], strides = [1, 1]} : vector<1x128xf32> to vector<1x16xf32>
    %c0_3 = arith.constant 0 : index
    %8 = memref.load %arg2[%c0_3] : memref<16xf32, #tpu.memory_space<smem>>
    %9 = vector.broadcast %8 : f32 to vector<1x16xf32>
    %10 = arith.addf %5, %9 : vector<1x16xf32>
    %cst_4 = arith.constant 0.000000e+00 : f32
    %11 = vector.broadcast %cst_4 : f32 to vector<1x16xf32>
    %12 = arith.maximumf %10, %11 : vector<1x16xf32>
    %c1 = arith.constant 1 : index
    %13 = memref.load %arg2[%c1] : memref<16xf32, #tpu.memory_space<smem>>
    %14 = vector.broadcast %13 : f32 to vector<1x16xf32>
    %15 = arith.addf %6, %14 : vector<1x16xf32>
    %cst_5 = arith.constant 0.000000e+00 : f32
    %16 = vector.broadcast %cst_5 : f32 to vector<1x16xf32>
    %17 = arith.maximumf %15, %16 : vector<1x16xf32>
    %c2 = arith.constant 2 : index
    %18 = memref.load %arg2[%c2] : memref<16xf32, #tpu.memory_space<smem>>
    %19 = vector.broadcast %18 : f32 to vector<1x16xf32>
    %20 = arith.addf %7, %19 : vector<1x16xf32>
    %cst_6 = arith.constant 0.000000e+00 : f32
    %21 = vector.broadcast %cst_6 : f32 to vector<1x16xf32>
    %22 = arith.maximumf %20, %21 : vector<1x16xf32>
    %c3 = arith.constant 3 : index
    %23 = memref.load %arg2[%c3] : memref<16xf32, #tpu.memory_space<smem>>
    %24 = vector.broadcast %23 : f32 to vector<1x16xf32>
    %25 = arith.mulf %24, %12 : vector<1x16xf32>
    %c4 = arith.constant 4 : index
    %26 = memref.load %arg2[%c4] : memref<16xf32, #tpu.memory_space<smem>>
    %27 = vector.broadcast %26 : f32 to vector<1x16xf32>
    %28 = arith.mulf %27, %17 : vector<1x16xf32>
    %29 = arith.addf %25, %28 : vector<1x16xf32>
    %c5 = arith.constant 5 : index
    %30 = memref.load %arg2[%c5] : memref<16xf32, #tpu.memory_space<smem>>
    %31 = vector.broadcast %30 : f32 to vector<1x16xf32>
    %32 = arith.mulf %31, %22 : vector<1x16xf32>
    %33 = arith.addf %29, %32 : vector<1x16xf32>
    %c9 = arith.constant 9 : index
    %34 = memref.load %arg2[%c9] : memref<16xf32, #tpu.memory_space<smem>>
    %35 = vector.broadcast %34 : f32 to vector<1x16xf32>
    %36 = arith.addf %33, %35 : vector<1x16xf32>
    %cst_7 = arith.constant 0.000000e+00 : f32
    %37 = vector.broadcast %cst_7 : f32 to vector<1x16xf32>
    %38 = arith.maximumf %36, %37 : vector<1x16xf32>
    %c6 = arith.constant 6 : index
    %39 = memref.load %arg2[%c6] : memref<16xf32, #tpu.memory_space<smem>>
    %40 = vector.broadcast %39 : f32 to vector<1x16xf32>
    %41 = arith.mulf %40, %12 : vector<1x16xf32>
    %c7 = arith.constant 7 : index
    %42 = memref.load %arg2[%c7] : memref<16xf32, #tpu.memory_space<smem>>
    %43 = vector.broadcast %42 : f32 to vector<1x16xf32>
    %44 = arith.mulf %43, %17 : vector<1x16xf32>
    %45 = arith.addf %41, %44 : vector<1x16xf32>
    %c8 = arith.constant 8 : index
    %46 = memref.load %arg2[%c8] : memref<16xf32, #tpu.memory_space<smem>>
    %47 = vector.broadcast %46 : f32 to vector<1x16xf32>
    %48 = arith.mulf %47, %22 : vector<1x16xf32>
    %49 = arith.addf %45, %48 : vector<1x16xf32>
    %c10 = arith.constant 10 : index
    %50 = memref.load %arg2[%c10] : memref<16xf32, #tpu.memory_space<smem>>
    %51 = vector.broadcast %50 : f32 to vector<1x16xf32>
    %52 = arith.addf %49, %51 : vector<1x16xf32>
    %cst_8 = arith.constant 0.000000e+00 : f32
    %53 = vector.broadcast %cst_8 : f32 to vector<1x16xf32>
    %54 = arith.maximumf %52, %53 : vector<1x16xf32>
    %c11 = arith.constant 11 : index
    %55 = memref.load %arg2[%c11] : memref<16xf32, #tpu.memory_space<smem>>
    %56 = vector.broadcast %55 : f32 to vector<1x16xf32>
    %57 = arith.mulf %56, %38 : vector<1x16xf32>
    %c12 = arith.constant 12 : index
    %58 = memref.load %arg2[%c12] : memref<16xf32, #tpu.memory_space<smem>>
    %59 = vector.broadcast %58 : f32 to vector<1x16xf32>
    %60 = arith.mulf %59, %54 : vector<1x16xf32>
    %61 = arith.addf %57, %60 : vector<1x16xf32>
    %c13 = arith.constant 13 : index
    %62 = memref.load %arg2[%c13] : memref<16xf32, #tpu.memory_space<smem>>
    %63 = vector.broadcast %62 : f32 to vector<1x16xf32>
    %64 = arith.addf %61, %63 : vector<1x16xf32>
    %cst_9 = arith.constant 0.000000e+00 : f32
    %65 = vector.broadcast %cst_9 : f32 to vector<1x16xf32>
    %66 = arith.maximumf %64, %65 : vector<1x16xf32>
    %67 = tpu.iota {dimensions = array<i32: 1>} : vector<1x16xi32>
    %c12_i32 = arith.constant 12 : i32
    %68 = vector.broadcast %c12_i32 : i32 to vector<1x16xi32>
    %69 = arith.cmpi eq, %67, %68 : vector<1x16xi32>
    %cst_10 = arith.constant 1.000000e+00 : f32
    %70 = vector.broadcast %cst_10 : f32 to vector<1x16xf32>
    %71 = arith.select %69, %70, %66 : vector<1x16xi1>, vector<1x16xf32>
    %c128 = arith.constant 128 : index
    %c0_11 = arith.constant 0 : index
    %72 = vector.load %arg1[%c128, %c0_11] : memref<144x128xf32, #tpu.memory_space<vmem>>, vector<16x128xf32>
    %cst_12 = arith.constant dense<0.000000e+00> : vector<1x128xf32>
    %73 = tpu.matmul %71, %72, %cst_12 {dimension_numbers = #tpu.dot_dimension_numbers<[1], [0], [0], [1], [0, 0, 1, 1], [], []>} : vector<1x16xf32>, vector<16x128xf32>, vector<1x128xf32> -> vector<1x128xf32>
    %cst_13 = arith.constant dense<0xFF800000> : vector<1xf32>
    %74 = vector.multi_reduction <maximumf>, %73, %cst_13 [1] : vector<1x128xf32> to vector<1xf32>
    %75 = vector.shape_cast %74 : vector<1xf32> to vector<1x1xf32>
    %76 = vector.broadcast %75 : vector<1x1xf32> to vector<1x128xf32>
    %77 = arith.subf %73, %76 : vector<1x128xf32>
    %78 = math.exp %77 : vector<1x128xf32>
    %cst_14 = arith.constant dense<0.000000e+00> : vector<1xf32>
    %79 = vector.multi_reduction <add>, %78, %cst_14 [1] : vector<1x128xf32> to vector<1xf32>
    %80 = vector.shape_cast %79 : vector<1xf32> to vector<1x1xf32>
    %81 = tpu.reciprocal %80 : vector<1x1xf32> -> vector<1x1xf32>
    %82 = vector.broadcast %81 : vector<1x1xf32> to vector<1x128xf32>
    %83 = arith.mulf %78, %82 : vector<1x128xf32>
    %c0_15 = arith.constant 0 : index
    %c0_16 = arith.constant 0 : index
    %84 = vector.load %arg3[%c0_15, %c0_16] : memref<1x128xf32, #tpu.memory_space<vmem>>, vector<1x128xf32>
    tpu.vector_store %arg3[%c0_15, %c0_16], %83 {strides = array<i32>} : memref<1x128xf32, #tpu.memory_space<vmem>>, vector<1x128xf32>,
    return
  }
}

</mosaic_0001>

<bundles_post_ra>
// kernel: net_forward.1
= control target key start
LH: loop header
LB: loop body
LE: loop exit
PB: predicated region body
PF: predicated region fallthrough
CT: control target
= control target key end

     0   :  { %8 = vsyncpa [#allocation3], 0  ;;  %s488_s0 = inlined_call_operand.vmem [shape: f32[1,128], index: 0, kind: input, shape index: {}]   ;;  %s489_s1 = inlined_call_operand.hbm [shape: f32[144,128], index: 1, kind: input, shape index: {}]   ;;  %s490_s2 = inlined_call_operand.vmem [shape: f32[16], index: 2, kind: input, shape index: {}]   ;;  %s491_s3 = inlined_call_operand.vmem [shape: f32[1,128], index: 3, kind: output, shape index: {}]  }
   0x1   :  { %9 = vsyncpa [#allocation4], 0  ;;  %s438_s12 = smov [#allocation2]   ;;  %s30_s16 = sshll.u32 %s490_s2, 4  ;;  %s31_s16 = int_to_ptr.vmem [resolvable:$true] %s30_s16 }
   0x2   :  { %s17_s13 = sshll.u32 %s438_s12, 4  ;;  %s400_s19 = scalar_lea.hbm %s489_s1, 2304  ;;  %s18_s13 = int_to_ptr.vmem [resolvable:$true] %s17_s13 }
   0x3   :  { %p401_p0 = scmp.ne.s32.totalorder %s489_s1, %s400_s19  ;;  %p404_p1 = scmp.lt.u32.totalorder %s400_s19, %s489_s1 }
   0x5   :  { %p406_p2 = pnand %p404_p1, %p401_p0 }
   0x7   :  { %409 = shalt.err (!%p406_p2)
}
   0x8   :  { %s410_s24 = scalar_lea.vmem %s18_s13, 2304  ;;  %p415_p4 = scmp.lt.s32.totalorder %s18_s13, %s18_s13 }
   0x9   :  { %p411_p3 = scmp.ne.s32.totalorder %s18_s13, %s410_s24  ;;  %p416_p5 = scmp.lt.s32.totalorder %s410_s24, %s410_s24 }
   0xb   :  { %p417_p6 = por %p416_p5, %p415_p4 }
   0xd   :  { %p418_p7 = pnand %p417_p6, %p411_p3 }
   0xf   :  { %421 = shalt.err (!%p418_p7)
}
  0x10   :  { %s439_s2 = smov 128   ;;  %s440_s25 = smov 8  }
  0x11   :  { %23 = dma.hbm_to_vmem [thread:$0]  %s489_s1, 2304, %s18_s13, [#allocation3], %s439_s2, %s439_s2, %s440_s25  }
  0x12   :  { %s422_s28 = scalar_lea.vmem %s31_s16, 16  ;;  %p427_p9 = scmp.lt.s32.totalorder %s31_s16, %s31_s16 }
  0x13   :  { %p423_p8 = scmp.ne.s32.totalorder %s31_s16, %s422_s28  ;;  %p428_p10 = scmp.lt.s32.totalorder %s422_s28, %s422_s28 }
  0x15   :  { %p429_p11 = por %p428_p10, %p427_p9 }
  0x17   :  { %p430_p12 = pnand %p429_p11, %p423_p8 }
  0x19   :  { %433 = shalt.err (!%p430_p12)
}
  0x1a   :  { %s441_s29 = smov [#allocation5]  }
  0x1b   :  { %33 = dma.vmem_to_smem %s31_s16, 16, %s441_s29, [#allocation4]  }
  0x1c   :  { %434 = dma.done.wait [#allocation3], 2304  }
  0x1d   :  { %435 = vsyncadd [#allocation3], 4294964992 }
  0x1e   :  { %436 = dma.done.wait [#allocation4], 16  }
  0x1f   :  { %437 = vsyncadd [#allocation4], 4294967280 }
  0x20   :  { %40 = sfence }
  0x21   :  { %v42_v0 = vld [vmem:[#allocation2] sm:$0xff]  ;;  %v43_v1 = vld [vmem:[#allocation2 + $0x8] sm:$0xff]  ;;  %v44_v2 = vld [vmem:[#allocation2 + $0x10] sm:$0xff]  ;;  %v442_v3 = vmov 0.0|0.0   ;;  %vm443_vm0 = vmmov 0   ;;  %v444_v6 = vmov 0.0  }
  0x22   :  { %360 = vmatprep.subr.bf16.mxu0 %v442_v3  ;;  %v361_v4 = vpack.c.bf16 %v43_v1, %v42_v0  ;;  %v45_v5 = vld [vmem:[#allocation2 + $0x18] sm:$0xff]  ;;  %350 = vmatprep.mubr.msk.f32.mxu0 %vm443_vm0, %v444_v6  ;;  %v46_v8 = vld [vmem:[#allocation2 + $0x20] sm:$0xff]  ;;  %v47_v9 = vld [vmem:[#allocation2 + $0x28] sm:$0xff]  ;;  %s445_s4 = smov 116   ;;  %s446_s5 = smov 104   ;;  %v185_v1 = vlaneseq  ;;  %vm191_vm2 = vcmask 130048  }
  0x23   :  { %384 = vmatprep.subr.bf16.mxu1 %v442_v3  ;;  %357 = vmatprep.mubr.msk.f32.mxu1 %vm443_vm0, %v444_v6  ;;  %v364_v7 = vpack.c.bf16 %v45_v5, %v44_v2  ;;  %v367_v10 = vpack.c.bf16 %v47_v9, %v46_v8  ;;  %v48_v11 = vld [vmem:[#allocation2 + $0x30] sm:$0xff]  ;;  %v49_v12 = vld [vmem:[#allocation2 + $0x38] sm:$0xff]  ;;  %v50_v14 = vld [vmem:[#allocation2 + $0x40] sm:$0xff]  ;;  %s132_s6 = sld [smem:[#allocation5]]  ;;  %s284_s7 = sld [smem:[#allocation5 + $0x1]]  ;;  %vm265_vm3 = vcmask 1040384  }
  0x24   :  { %362 = vmatpush3.bf16.msra.mxu0 %v361_v4  ;;  %v370_v13 = vpack.c.bf16 %v49_v12, %v48_v11  ;;  %v51_v15 = vld [vmem:[#allocation2 + $0x48] sm:$0xff]  ;;  %v52_v17 = vld [vmem:[#allocation2 + $0x50] sm:$0xff]  ;;  %v53_v18 = vld [vmem:[#allocation2 + $0x58] sm:$0xff]  ;;  %s287_s8 = sld [smem:[#allocation5 + $0x4]]  ;;  %s291_s9 = sld [smem:[#allocation5 + $0x7]] }
  0x25   :  { %363 = vmatprep.subr.bf16.mxu0 %v442_v3  ;;  %v373_v16 = vpack.c.bf16 %v51_v15, %v50_v14  ;;  %v376_v19 = vpack.c.bf16 %v53_v18, %v52_v17  ;;  %v54_v20 = vld [vmem:[#allocation2 + $0x60] sm:$0xff]  ;;  %v55_v21 = vld [vmem:[#allocation2 + $0x68] sm:$0xff]  ;;  %v56_v23 = vld [vmem:[#allocation2 + $0x70] sm:$0xff]  ;;  %s285_s10 = sld [smem:[#allocation5 + $0x2]]  ;;  %s286_s11 = sld [smem:[#allocation5 + $0x3]] }
  0x26   :  { %v379_v22 = vpack.c.bf16 %v55_v21, %v54_v20  ;;  %v57_v24 = vld [vmem:[#allocation2 + $0x78] sm:$0xff]  ;;  %v41_v26 = vld [vmem:[%s488_s0] sm:$0x1]  ;;  %v190_v30 = vld [vmem:[#allocation2 + $0x88] sm:$0xff]  ;;  %s290_s12 = sld [smem:[#allocation5 + $0x6]]  ;;  %s288_s0 = sld [smem:[#allocation5 + $0x5]] }
  0x27   :  { %v382_v25 = vpack.c.bf16 %v57_v24, %v56_v23  ;;  %v189_v29 = vld [vmem:[#allocation2 + $0x80] sm:$0xff]  ;;  %s292_s13 = sld [smem:[#allocation5 + $0x8]]  ;;  %s289_s14 = sld [smem:[#allocation5 + $0x9]] }
  0x28   :  { %365 = vmatpush3.bf16.msra.mxu0 %v364_v7  ;;  %v385_v31 = vpack.c.bf16 %v190_v30, %v189_v29  ;;  %s293_s15 = sld [smem:[#allocation5 + $0xa]]  ;;  %s294_s16 = sld [smem:[#allocation5 + $0xb]]  ;;  %v186_v7 = vand.u32 127, %v185_v1 }
  0x29   :  { %366 = vmatprep.subr.bf16.mxu0 %v442_v3  ;;  %v133_v32 = vstv %s132_s6  ;;  %v137_v33 = vstv %s284_s7  ;;  %s295_s17 = sld [smem:[#allocation5 + $0xc]]  ;;  %s296_s18 = sld [smem:[#allocation5 + $0xd]] }
  0x2a   :  { %386 = vmatpush3.bf16.msra.mxu1 %v385_v31  ;;  %v148_v37 = vstv %s287_s8  ;;  %v163_v38 = vstv %s291_s9  ;;  %vm187_vm1 = vcmp.eq.s32.totalorder %v186_v7, 12 }
  0x2b   :  { %v141_v39 = vstv %s285_s10  ;;  %v145_v42 = vstv %s286_s11 }
  0x2c   :  { %368 = vmatpush3.bf16.msra.mxu0 %v367_v10  ;;  %v160_v43 = vstv %s290_s12  ;;  %v152_v48 = vstv %s288_s0 }
  0x2d   :  { %369 = vmatprep.subr.bf16.mxu0 %v442_v3  ;;  %v167_v49 = vstv %s292_s13  ;;  %v156_v57 = vstv %s289_s14 }
  0x2e   :  { %v171_v58 = vstv %s293_s15  ;;  %v175_v63 = vstv %s294_s16 }
  0x2f   :  { %v178_v0 = vstv %s295_s17  ;;  %v182_v6 = vstv %s296_s18 }
  0x30   :  { %371 = vmatpush3.bf16.msra.mxu0 %v370_v13 }
  0x31   :  { %372 = vmatprep.subr.bf16.mxu0 %v442_v3 }
  0x34   :  { %374 = vmatpush3.bf16.msra.mxu0 %v373_v16 }
  0x35   :  { %375 = vmatprep.subr.bf16.mxu0 %v442_v3 }
  0x38   :  { %377 = vmatpush3.bf16.msra.mxu0 %v376_v19 }
  0x39   :  { %378 = vmatprep.subr.bf16.mxu0 %v442_v3 }
  0x3c   :  { %380 = vmatpush3.bf16.msra.mxu0 %v379_v22 }
  0x3d   :  { %381 = vmatprep.subr.bf16.mxu0 %v442_v3 }
  0x40   :  { %383 = vmatpush3.bf16.msra.mxu0 %v382_v25 }
  0x43   :  { %351 = vmatmul.mubr.f32.vlgmr.msra.gmra.mrb[0].mxu0 %v41_v26 }
 0x116   :  { %v124_v27 = vpop.f32.mrb[0].mxu0 }
 0x117   :  { %128 = vrot.lane.b32.xlu0 %v124_v27, %s445_s4  ;;  %v352_v28 = vpop.f32.mrb[1].mxu0  ;;  %v134_v34 = vadd.f32 %v133_v32, %v124_v27 }
 0x119   :  { %v135_v40 = vmax.f32 %v134_v34, 0.0 }
 0x11b   :  { %130 = vrot.lane.b32.xlu0 %v124_v27, %s446_s5  ;;  %v146_v50 = vmul.f32 %v145_v42, %v135_v40  ;;  %v161_v51 = vmul.f32 %v160_v43, %v135_v40 }
 0x189   :  { %v129_v35 = vpop.permute.xlu0 %128 }
 0x18a   :  { %v138_v36 = vadd.f32 %v137_v33, %v129_v35 }
 0x18c   :  { %v139_v41 = vmax.f32 %v138_v36, 0.0 }
 0x18d   :  { %v131_v44 = vpop.permute.xlu0 %130 }
 0x18e   :  { %v149_v45 = vmul.f32 %v148_v37, %v139_v41  ;;  %v164_v46 = vmul.f32 %v163_v38, %v139_v41  ;;  %v142_v47 = vadd.f32 %v141_v39, %v131_v44 }
 0x190   :  { %v143_v52 = vmax.f32 %v142_v47, 0.0  ;;  %v150_v53 = vadd.f32 %v149_v45, %v146_v50  ;;  %v165_v54 = vadd.f32 %v164_v46, %v161_v51 }
 0x192   :  { %v153_v55 = vmul.f32 %v152_v48, %v143_v52  ;;  %v168_v56 = vmul.f32 %v167_v49, %v143_v52 }
 0x194   :  { %v154_v59 = vadd.f32 %v153_v55, %v150_v53  ;;  %v169_v60 = vadd.f32 %v168_v56, %v165_v54 }
 0x196   :  { %v157_v61 = vadd.f32 %v156_v57, %v154_v59  ;;  %v172_v62 = vadd.f32 %v171_v58, %v169_v60 }
 0x198   :  { %v158_v2 = vmax.f32 %v157_v61, 0.0  ;;  %v173_v3 = vmax.f32 %v172_v62, 0.0 }
 0x19a   :  { %v176_v4 = vmul.f32 %v175_v63, %v158_v2  ;;  %v179_v5 = vmul.f32 %v178_v0, %v173_v3 }
 0x19c   :  { %v180_v8 = vadd.f32 %v179_v5, %v176_v4 }
 0x19e   :  { %v183_v9 = vadd.f32 %v182_v6, %v180_v8 }
 0x1a0   :  { %v184_v10 = vmax.f32 %v183_v9, 0.0 }
 0x1a2   :  { %v188_v11 = vsel %vm187_vm1, 1.0, %v184_v10 }
 0x1a3   :  { %358 = vmatmul.mubr.msk.f32.vlgmr.msra.gmra.mrb[0].mxu1 %vm191_vm2, %v188_v11 }
 0x276   :  { %v261_v12 = vpop.f32.mrb[0].mxu1 }
 0x277   :  { %v359_v13 = vpop.f32.mrb[1].mxu1  ;;  %v266_v14 = vsel %vm265_vm3, %v261_v12, -inf }
 0x278   :  { %267 = vmax.xlane.f32.xlu1 %v266_v14 }
 0x305   :  { %v268_v15 = vpop.xlane.xlu1 %267 }
 0x306   :  { %v269_v16 = vsub.f32 %v261_v12, %v268_v15 }
 0x308   :  { %v270_v17 = vmul.f32 1.442695, %v269_v16 }
 0x30a   :  { %396 = vpow2.f32 %v270_v17 }
 0x314   :  { %v397_v18 = vpop.eup %396 }
 0x315   :  { %v272_v19 = vsel %vm265_vm3, %v397_v18, 0.0 }
 0x316   :  { %273 = vadd.xlane.f32.xlu1 %v272_v19 }
 0x3a3   :  { %v274_v20 = vpop.xlane.xlu1 %273 }
 0x3a4   :  { %398 = vrcp.f32 %v274_v20 }
 0x3ae   :  { %v399_v21 = vpop.eup %398 }
 0x3af   :  { %v276_v22 = vmul.f32 %v399_v21, %v397_v18 }
 0x3b1   :  { %277 = vst [vmem:[%s491_s3] sm:$0x1] %v276_v22 }
 0x3b2   :  { %282 = vsyncpa [#allocation3], 1 }
 0x3b3   :  { %283 = vsyncpa [#allocation4], 1 }

</bundles_post_ra>
